<compile_context>
chip_gen: v5e
topology: v5e:2x2
jax: 0.10.0
libtpu: 0.0.40
codegen_flags: <defaults>
</compile_context>

<pallas_src>
import math

import numpy as np

import jax
import jax.numpy as jnp
from jax import lax
from jax.experimental import pallas as pl
from jax.experimental.pallas import tpu as pltpu


# ----------------------------- parameter setup ------------------------------
def _gauss1d_np(kernel_size: int, sigma: float) -> np.ndarray:
    """Normalized 1-D Gaussian (float64); outer(v, v) == SIFT_Layer._gauss2D."""
    center = kernel_size // 2
    if sigma <= 0:
        sigma = ((kernel_size - 1) * 0.5 - 1) * 0.3 + 0.8
    s = sigma ** 2
    v = np.array([math.exp(-((i - center) ** 2) / (2.0 * s))
                  for i in range(kernel_size)], dtype=np.float64)
    return v / v.sum()


def _gauss2d_np(kernel_size: int, sigma: float) -> np.ndarray:
    """Normalized (k, k) Gaussian, identical to SIFT_Layer._gauss2D's core."""
    v = _gauss1d_np(kernel_size, sigma)
    return np.outer(v, v)


def _conv1d_matrix(n: int, taps: np.ndarray, pad: int) -> np.ndarray:
    """(m, n) matrix == 1-D cross-correlation with `taps`, zero padding `pad`,
    stride 1 (one spatial axis of F.conv2d)."""
    k = len(taps)
    m = n + 2 * pad - k + 1
    a = np.zeros((m, n), dtype=np.float64)
    for i in range(m):
        for t in range(k):
            j = i + t - pad
            if 0 <= j < n:
                a[i, j] += taps[t]
    return a


def _bilinear_upsample_matrix(n: int, scale: int = 2) -> np.ndarray:
    """(scale*n, n) matrix == F.interpolate(mode='bilinear',
    align_corners=False, scale_factor=scale) along one spatial axis."""
    m = scale * n
    u = np.zeros((m, n), dtype=np.float64)
    for y in range(m):
        src = max((y + 0.5) / scale - 0.5, 0.0)
        i0 = int(math.floor(src))
        i1 = min(i0 + 1, n - 1)
        lam = src - i0
        u[y, i0] += 1.0 - lam
        u[y, i1] += lam
    return u


# -------------------------------- the kernel --------------------------------
def _sift_fused_kernel(x_ref, l_ref, r_ref, o_ref):
    # x_ref : (B, C, H, W)  input image block (zero padding folded into L/R)
    # l_ref : (Hf, H)       fused row operator  (C * conv2 @ upsample @ conv1)
    # r_ref : (W, Wf)       fused column operator (transposed)
    # o_ref : (B, Hf, Wf)   per-channel-identical output slab
    B, C, H, W = x_ref.shape
    Hf, Wf = o_ref.shape[1], o_ref.shape[2]

    # Channel reduction: the conv weights are identical for every (out, in)
    # channel pair, so the whole chain only ever sees sum_c x[c] (VPU adds).
    s = jnp.sum(x_ref[...].astype(jnp.float32), axis=1)              # (B, H, W)

    # Column operator: one MXU matmul for the whole image block
    # (H is kept 8-aligned whenever B > 1, so the merge is tile-aligned).
    t = jnp.dot(s.reshape(B * H, W), r_ref[...],
                preferred_element_type=jnp.float32)                  # (B*H, Wf)

    # Row operator: per-image (Hf,H) x (H,Wf) contraction, batched over B.
    if B == 1:
        u = jnp.dot(l_ref[...], t,
                    preferred_element_type=jnp.float32)[None]        # (1, Hf, Wf)
    else:
        lb = jnp.broadcast_to(l_ref[...][None, :, :], (B, Hf, H))
        u = jnp.einsum('bgh,bhw->bgw', lb, t.reshape(B, H, Wf),
                       preferred_element_type=jnp.float32)           # (B, Hf, Wf)

    o_ref[...] = u.astype(o_ref.dtype)


# ------------------------------- python wrapper ------------------------------
class SIFTLayerPallas:
    """Pallas-TPU implementation of SIFT_Layer.forward (NCHW layout)."""

    def __init__(self, img_shape, group=1, sigma=1.0, double_base=True):
        self.C = int(img_shape[0])
        self.group = group
        self.sigma = float(sigma)
        self.double_base = bool(double_base)
        self.k1, self.k2 = 5, 9
        self.pad = 1  # both F.conv2d calls in the module use padding=1
        self.v1 = _gauss1d_np(self.k1, sigma)
        self.v2 = _gauss1d_np(self.k2, sigma)
        self.g1 = _gauss2d_np(self.k1, sigma).astype(np.float32)
        self.g2 = _gauss2d_np(self.k2, sigma).astype(np.float32)
        # The module constructs both biases as zeros; any nonzero bias is folded
        # in as a host-precomputed constant plane (never inside the kernel).
        self.bias1 = np.zeros((self.C,), np.float32)
        self.bias2 = np.zeros((self.C,), np.float32)
        self._op_cache = {}

    # -- host-side operator construction (float64, then cast to f32) ----------
    def _axis_operator(self, n: int):
        a1 = _conv1d_matrix(n, self.v1, self.pad)                 # (n1, n)
        u = (_bilinear_upsample_matrix(a1.shape[0]) if self.double_base
             else np.eye(a1.shape[0]))
        a2 = _conv1d_matrix(u.shape[0], self.v2, self.pad)        # (nf, nu)
        fused = a2 @ u @ a1                                       # (nf, n)
        ones_resp = a2 @ np.ones((u.shape[0],))                   # conv2(const)
        return fused, ones_resp

    def _operators(self, H: int, W: int):
        key = (H, W)
        if key not in self._op_cache:
            l_row, row_ones = self._axis_operator(H)              # (Hf, H)
            r_col, col_ones = self._axis_operator(W)              # (Wf, W)
            Hf, Wf = l_row.shape[0], r_col.shape[0]
            # conv2 sums C identical input channels -> fold the factor C into L.
            l_mat = jnp.asarray(self.C * l_row, jnp.float32)      # (Hf, H)
            r_mat = jnp.asarray(r_col.T, jnp.float32)             # (W, Wf)
            # Affine (bias) part: conv1 bias passes through the upsample
            # unchanged, conv2 sums it over channels and attenuates it at the
            # zero-padded border; conv2 bias is purely additive.
            bias_plane = (float(self.bias1.sum())
                          * np.outer(row_ones, col_ones)[None, :, :]
                          + self.bias2[:, None, None]).astype(np.float32)
            self._op_cache[key] = (Hf, Wf, l_mat, r_mat, bias_plane)
        return self._op_cache[key]

    # -- block-size selection ---------------------------------------------------
    @staticmethod
    def _vmem_bytes(B, C, H, W, Hf, Wf, x_itemsize):
        x_tile = B * C * H * W * x_itemsize
        out_tile = B * Hf * Wf * 4
        ops = (Hf * H + W * Wf) * 4
        live = (B * H * W + B * H * Wf + B * Hf * H + B * Hf * Wf) * 4
        return 2 * (x_tile + out_tile) + ops + live     # double-buffered x / out

    def _pick_block(self, N, C, H, W, Hf, Wf, x_itemsize):
        divs = [d for d in range(1, min(N, 8) + 1) if N % d == 0]
        cap = max(1, N // 2)                  # keep >= 2 grid steps (v7x: 2 TCs)
        cands = [d for d in divs if d <= cap] or [1]
        B = max(cands)
        if H % 8 != 0:
            B = 1                             # keep (B,H,W)->(B*H,W) merge tile-aligned
        # Shrink against a ~48 MiB budget so v7x's 64 MiB VMEM stays double-buffered.
        while B > 1 and self._vmem_bytes(B, C, H, W, Hf, Wf, x_itemsize) > 48 * 2 ** 20:
            B = max([d for d in divs if d < B] or [1])
        return B

    def __call__(self, x):
        N, C, H, W = x.shape
        assert C == self.C, "channel mismatch with the shape given at init"
        Hf, Wf, l_mat, r_mat, bias_plane = self._operators(H, W)
        itemsize = int(np.dtype(x.dtype).itemsize)
        B = self._pick_block(N, C, H, W, Hf, Wf, itemsize)
        vmem_limit = int(min(56 * 2 ** 20,
                             max(32 * 2 ** 20,
                                 2 * self._vmem_bytes(B, C, H, W, Hf, Wf, itemsize))))

        out = pl.pallas_call(
            _sift_fused_kernel,
            out_shape=jax.ShapeDtypeStruct((N, Hf, Wf), jnp.float32),
            grid=(N // B,),
            in_specs=[
                pl.BlockSpec((B, C, H, W), lambda n: (n, 0, 0, 0)),
                pl.BlockSpec((Hf, H), lambda n: (0, 0)),   # grid-invariant operator
                pl.BlockSpec((W, Wf), lambda n: (0, 0)),   # grid-invariant operator
            ],
            out_specs=pl.BlockSpec((B, Hf, Wf), lambda n: (n, 0, 0)),
            compiler_params=pltpu.CompilerParams(
                dimension_semantics=("parallel",),          # image blocks independent
                vmem_limit_bytes=vmem_limit),
        )(x, l_mat, r_mat)                   # x in native dtype; kernel casts in-register

        # Every output channel is identical -> broadcast lazily in the wrapper
        # instead of writing a Cx larger tensor from the kernel.
        out = jnp.broadcast_to(out[:, None, :, :], (N, self.C, Hf, Wf))
        if np.any(bias_plane):               # zero for this module; kernel stays bias-free
            out = out + jnp.asarray(bias_plane)[None]
        return out


# ------------------------------ pure-JAX reference ---------------------------
def reference_forward(x, layer: SIFTLayerPallas):
    """Plain-JAX (XLA) step-by-step version of the same forward, for checking."""
    prec = lax.Precision.HIGHEST
    C = x.shape[1]
    w1 = jnp.broadcast_to(jnp.asarray(layer.g1), (C, C, layer.k1, layer.k1))
    w2 = jnp.broadcast_to(jnp.asarray(layer.g2), (C, C, layer.k2, layer.k2))
    dn = ("NCHW", "OIHW", "NCHW")
    y = lax.conv_general_dilated(x, w1, (1, 1), [(1, 1), (1, 1)],
                                 dimension_numbers=dn, precision=prec)
    y = y + jnp.asarray(layer.bias1)[None, :, None, None]
    if layer.double_base:
        uh = jnp.asarray(_bilinear_upsample_matrix(y.shape[2]), jnp.float32)
        uw = jnp.asarray(_bilinear_upsample_matrix(y.shape[3]), jnp.float32)
        y = jnp.einsum("ym,ncmw->ncyw", uh, y, precision=prec)
        y = jnp.einsum("ncyw,zw->ncyz", y, uw, precision=prec)
    y = lax.conv_general_dilated(y, w2, (1, 1), [(1, 1), (1, 1)],
                                 dimension_numbers=dn, precision=prec)
    y = y + jnp.asarray(layer.bias2)[None, :, None, None]
    return y


# ----------------------------------- main ------------------------------------
if __name__ == "__main__":
    # -- primary check: batch=2, channels=4, 16x16 images (B=1, grid=2) --------
    N, C, H, W = 2, 4, 16, 16
    x = jax.random.normal(jax.random.PRNGKey(0), (N, C, H, W), dtype=jnp.float32)
    layer = SIFTLayerPallas(img_shape=(C, H, W), sigma=1.0, double_base=True)
    out = jax.block_until_ready(layer(x))
    # conv1 (pad=1,k=5): 16->14, upsample x2: ->28, conv2 (pad=1,k=9): ->22
    assert out.shape == (N, C, 2 * (H - 2) - 6, 2 * (W - 2) - 6), out.shape
    ref = jax.block_until_ready(reference_forward(x, layer))
    # Kernel matmuls run at default MXU precision now -> slightly looser
    # tolerance than the HIGHEST-precision reference.
    np.testing.assert_allclose(np.asarray(out), np.asarray(ref),
                               rtol=2e-2, atol=2e-2)

    # -- secondary check: batched image block (B=2, grid=2), rectangular -------
    N2, C2, H2, W2 = 4, 3, 16, 24
    x2 = jax.random.normal(jax.random.PRNGKey(1), (N2, C2, H2, W2),
                           dtype=jnp.float32)
    layer2 = SIFTLayerPallas(img_shape=(C2, H2, W2), sigma=1.0, double_base=True)
    out2 = jax.block_until_ready(layer2(x2))
    ref2 = jax.block_until_ready(reference_forward(x2, layer2))
    np.testing.assert_allclose(np.asarray(out2), np.asarray(ref2),
                               rtol=2e-2, atol=2e-2)

    print("KERNEL_OK")
</pallas_src>

<mosaic_0001>
module attributes {stable_mosaic.version = 11 : i64} {
  func.func @_sift_fused_kernel(%arg0: i32, %arg1: memref<1x4x16x16xf32, #tpu.memory_space<vmem>>, %arg2: memref<22x16xf32, #tpu.memory_space<vmem>>, %arg3: memref<16x22xf32, #tpu.memory_space<vmem>>, %arg4: memref<1x22x22xf32, #tpu.memory_space<vmem>>) attributes {dimension_semantics = [#tpu.dimension_semantics<parallel>], iteration_bounds = array<i64: 2>, scalar_prefetch = 0 : i64, scratch_operands = 0 : i64, tpu.core_type = #tpu.core_type<tc>, window_params = [{transform_indices = @transform_0, window_bounds = array<i64: 1, 4, 16, 16>}, {pipeline_mode = #tpu.pipeline_mode<synchronous>, transform_indices = @transform_1, window_bounds = array<i64: 22, 16>}, {pipeline_mode = #tpu.pipeline_mode<synchronous>, transform_indices = @transform_2, window_bounds = array<i64: 16, 22>}, {transform_indices = @transform_3, window_bounds = array<i64: 1, 22, 22>}]} {
    %c0 = arith.constant 0 : index
    %c0_0 = arith.constant 0 : index
    %c0_1 = arith.constant 0 : index
    %c0_2 = arith.constant 0 : index
    %0 = vector.load %arg1[%c0, %c0_0, %c0_1, %c0_2] : memref<1x4x16x16xf32, #tpu.memory_space<vmem>>, vector<1x4x16x16xf32>
    %cst = arith.constant dense<0.000000e+00> : vector<1x16x16xf32>
    %1 = vector.multi_reduction <add>, %0, %cst [1] : vector<1x4x16x16xf32> to vector<1x16x16xf32>
    %2 = vector.shape_cast %1 : vector<1x16x16xf32> to vector<16x16xf32>
    %c0_3 = arith.constant 0 : index
    %c0_4 = arith.constant 0 : index
    %3 = vector.load %arg3[%c0_3, %c0_4] : memref<16x22xf32, #tpu.memory_space<vmem>>, vector<16x22xf32>
    %cst_5 = arith.constant dense<0.000000e+00> : vector<16x22xf32>
    %4 = tpu.matmul %2, %3, %cst_5 {dimension_numbers = #tpu.dot_dimension_numbers<[1], [0], [0], [1], [0, 0, 1, 1], [], []>} : vector<16x16xf32>, vector<16x22xf32>, vector<16x22xf32> -> vector<16x22xf32>
    %c0_6 = arith.constant 0 : index
    %c0_7 = arith.constant 0 : index
    %5 = vector.load %arg2[%c0_6, %c0_7] : memref<22x16xf32, #tpu.memory_space<vmem>>, vector<22x16xf32>
    %cst_8 = arith.constant dense<0.000000e+00> : vector<22x22xf32>
    %6 = tpu.matmul %5, %4, %cst_8 {dimension_numbers = #tpu.dot_dimension_numbers<[1], [0], [0], [1], [0, 0, 1, 1], [], []>} : vector<22x16xf32>, vector<16x22xf32>, vector<22x22xf32> -> vector<22x22xf32>
    %7 = vector.shape_cast %6 : vector<22x22xf32> to vector<1x22x22xf32>
    %c0_9 = arith.constant 0 : index
    %c0_10 = arith.constant 0 : index
    %c0_11 = arith.constant 0 : index
    %8 = vector.load %arg4[%c0_9, %c0_10, %c0_11] : memref<1x22x22xf32, #tpu.memory_space<vmem>>, vector<1x22x22xf32>
    tpu.vector_store %arg4[%c0_9, %c0_10, %c0_11], %7 {strides = array<i32>} : memref<1x22x22xf32, #tpu.memory_space<vmem>>, vector<1x22x22xf32>,
    return
  }
  func.func @transform_0(%arg0: i32) -> (i32, i32, i32, i32) {
    %c0_i32 = arith.constant 0 : i32
    %c0_i32_0 = arith.constant 0 : i32
    %c0_i32_1 = arith.constant 0 : i32
    %c0_i32_2 = arith.constant 0 : i32
    return %arg0, %c0_i32, %c0_i32_0, %c0_i32_1 : i32, i32, i32, i32
  }
  func.func @transform_1(%arg0: i32) -> (i32, i32) {
    %c0_i32 = arith.constant 0 : i32
    %c0_i32_0 = arith.constant 0 : i32
    %c0_i32_1 = arith.constant 0 : i32
    return %c0_i32, %c0_i32_0 : i32, i32
  }
  func.func @transform_2(%arg0: i32) -> (i32, i32) {
    %c0_i32 = arith.constant 0 : i32
    %c0_i32_0 = arith.constant 0 : i32
    %c0_i32_1 = arith.constant 0 : i32
    return %c0_i32, %c0_i32_0 : i32, i32
  }
  func.func @transform_3(%arg0: i32) -> (i32, i32, i32) {
    %c0_i32 = arith.constant 0 : i32
    %c0_i32_0 = arith.constant 0 : i32
    %c0_i32_1 = arith.constant 0 : i32
    return %arg0, %c0_i32, %c0_i32_0 : i32, i32, i32
  }
}

</mosaic_0001>

<bundles_post_ra>
// kernel: tpu_custom_call.1
= control target key start
LH: loop header
LB: loop body
LE: loop exit
PB: predicated region body
PF: predicated region fallthrough
CT: control target
= control target key end

     0   :  { %8 = vsyncpa [#allocation3], 0  ;;  %s628_s0 = inlined_call_operand.hbm [shape: f32[2,4,16,16], index: 0, kind: input, shape index: {}]   ;;  %s629_s1 = inlined_call_operand.vmem [shape: f32[22,16], index: 1, kind: input, shape index: {}]   ;;  %s630_s2 = inlined_call_operand.vmem [shape: f32[16,22], index: 2, kind: input, shape index: {}]   ;;  %s631_s3 = inlined_call_operand.vmem [shape: f32[2,22,22], index: 3, kind: output, shape index: {}]  }
   0x1   :  { %10 = vsyncpa [#allocation3 + $0x1], 0  ;;  %s508_s12 = smov 0   ;;  %s510_s13 = smov 0  }
   0x2   :  { %s512_s14 = smov 0   ;;  %s514_s15 = smov 0  }
   0x3 LB: > { %s527_s16 = sadd.s32 4294967295, %s484_s15   ;;  %s530_s17 = sadd.s32 1, %s484_s15   ;;  %s484_s15 = sphi %s514_s15, %s638_s15   ;;  %s480_s14 = sphi %s512_s14, %s637_s14   ;;  %s476_s13 = sphi %s510_s13, %s636_s13   ;;  %s472_s12 = sphi %s508_s12, %s635_s12  }
   0x4   : > { %s20_s18 = ssub.s32 %s484_s15, %s530_s17  ;;  %s23_s19 = sadd.s32 1, %s480_s14 }
   0x5   : > { %p21_p0 = scmp.eq.s32.totalorder %s20_s18, 0  ;;  %p30_p1 = scmp.ne.s32.totalorder %s480_s14, %s476_s13 }
   0x6   : > { %p31_p2 = scmp.eq.s32.totalorder %s484_s15, 0  ;;  %p36_p3 = scmp.ne.s32.totalorder %s476_s13, %s472_s12 }
   0x7   : > { %s540_s20 = scalar_select %p21_p0, %s480_s14, %s23_s19  }
   0x8   : > { %p542_p4 = por %p31_p2, %p30_p1  ;;  %p37_p5 = scmp.eq.s32.totalorder %s527_s16, 0 }
   0x9   : > { %p385_p6 = scmp.lt.s32.totalorder %s484_s15, 2  ;;  %s134_s23 = sand.u32 1, %s480_s14  }
   0xa   : > { %p548_p7 = por %p37_p5, %p36_p3  ;;  %s360_s24 = sshll.u32 %s134_s23, 6 }
   0xb   : > { %s373_s25 = sshll.u32 %s484_s15, 6  ;;  %s138_s29 = scalar_lea.vmem [#allocation2], %s360_s24 }
   0xc   : > { %s143_s28 = scalar_lea.hbm %s628_s0, %s373_s25  ;;  %s146_s30 = sshll.u32 %s138_s29, 4  ;;  %s147_s30 = int_to_ptr.vmem [resolvable:$true] %s146_s30 }
   0xd   : > { %s144_s4 = sshll.u32 %s143_s28, 4  ;;  %p559_p8 = pnand %p385_p6, %p542_p4  ;;  %s145_s4 = int_to_ptr.hbm [resolvable:$true] %s144_s4 }
   0xe   : > { %p363_p9 = scmp.ge.s32.totalorder %s484_s15, 1  ;;  %s135_s6 = scalar_lea.sflag [#allocation3], %s134_s23 }
   0xf   : > { %s420_s7 = sshra.s32 %s145_s4, 4  ;;  %p424_p11 = pneg %p559_p8  ;;  %s421_s7 = int_to_ptr.hbm [resolvable:$true] %s420_s7 }
  0x10   : > { %s422_s8 = scalar_lea.hbm %s421_s7, 64  ;;  %s427_s11 = scalar_lea.hbm %s628_s0, 128 }
  0x11   : > { %p423_p10 = scmp.ne.s32.totalorder %s421_s7, %s422_s8  ;;  %p428_p0 = scmp.lt.s32.totalorder %s421_s7, %s628_s0 }
  0x12   : > { %p429_p1 = scmp.lt.s32.totalorder %s427_s11, %s422_s8 }
  0x13   : > { %p425_p12 = pnand %p424_p11, %p423_p10 }
  0x14   : > { %p430_p2 = por %p429_p1, %p428_p0 }
  0x15   : > { %p426_p13 = pneg %p425_p12 }
  0x17   : > { %p431_p3 = pnand %p430_p2, %p426_p13 }
  0x19   : > { %434 = shalt.err (!%p431_p3)
}
  0x1a   : > { %s486_s19 = smov 128   ;;  %s487_s21 = smov 8  }
  0x1b   : > { %384 = dma.hbm_to_vmem [thread:$0]  (!%p559_p8), %s145_s4, 1024, %s147_s30, %s135_s6, %s486_s19, %s486_s19, %s487_s21  }
  0x1c   : > { %p154_p4 = scmp.lt.s32.totalorder %s484_s15, 3 }
  0x1e   : > { %p155_p5 = pnand %p363_p9, %p154_p4 }
  0x1f   : > { %s160_s23 = sand.u32 (!%p155_p5), 1, %s476_s13  }
  0x20   : > { %158 = sbr.rel (%p155_p5) target bundleno = 323 (0x143), region = 32  ;;  %s364_s24 = sshll.u32 (!%p155_p5), %s160_s23, 6 }
  0x21   : > { %s161_s25 = scalar_lea.sflag (!%p155_p5), [#allocation3], %s160_s23  ;;  %s164_s26 = scalar_lea.vmem (!%p155_p5), [#allocation2], %s364_s24 }
  0x25   : > { %467 = dma.done.wait (%p548_p7), %s161_s25, 1024  }
  0x26   : > { %469 = vsyncadd (%p548_p7), %s161_s25, 4294966272  ;;  %vm201_vm0 = vcmask 130048   ;;  %v217_v0 = vld [vmem:[%s630_s2 + $0x8] sm:$0xff]  ;;  %v216_v1 = vld [vmem:[%s630_s2] sm:$0xff]  ;;  %p188_p6 = scmp.lt.s32.totalorder %s527_s16, 1  ;;  %vm285_vm1 = vcmask 179200  }
  0x27   : > { %v194_v2 = vld [vmem:[%s164_s26 + $0x8] sm:$0xff]  ;;  %374 = vmatpush.msra.mxu3 %v217_v0  ;;  %v196_v3 = vld [vmem:[%s164_s26 + $0x18] sm:$0xff]  ;;  %238 = vmatpush.msra.mxu0 %v217_v0  ;;  %v193_v9 = vld [vmem:[%s164_s26] sm:$0xff]  ;;  %vm288_vm2 = vcmask 177152  }
  0x28   : > { %v198_v4 = vld [vmem:[%s164_s26 + $0x28] sm:$0xff]  ;;  %v200_v5 = vld [vmem:[%s164_s26 + $0x38] sm:$0xff]  ;;  %v209_v6 = vsel %vm201_vm0, %v194_v2, 0.0  ;;  %v210_v7 = vsel %vm201_vm0, %v196_v3, 0.0  ;;  %v195_v10 = vld [vmem:[%s164_s26 + $0x10] sm:$0xff]  ;;  %v202_v14 = vsel %vm201_vm0, %v193_v9, 0.0 }
  0x29   : > { %v212_v8 = vsel %vm201_vm0, %v198_v4, 0.0  ;;  %v197_v11 = vld [vmem:[%s164_s26 + $0x20] sm:$0xff]  ;;  %375 = vmatpush.msra.mxu3 %v216_v1  ;;  %v211_v12 = vadd.f32 %v210_v7, %v209_v6  ;;  %239 = vmatpush.msra.mxu0 %v216_v1  ;;  %v199_v13 = vld [vmem:[%s164_s26 + $0x30] sm:$0xff]  ;;  %v203_v15 = vsel %vm201_vm0, %v195_v10, 0.0  ;;  %v214_v17 = vsel %vm201_vm0, %v200_v5, 0.0  ;;  %v248_v26 = vld [vmem:[%s629_s1 + $0x8] sm:$0xff] }
  0x2a   : > { %v205_v16 = vsel %vm201_vm0, %v197_v11, 0.0  ;;  %v204_v18 = vadd.f32 %v203_v15, %v202_v14  ;;  %v207_v20 = vsel %vm201_vm0, %v199_v13, 0.0  ;;  %v247_v27 = vld [vmem:[%s629_s1] sm:$0xff]  ;;  %v249_v28 = vld [vmem:[%s629_s1 + $0x10] sm:$0x3f]  ;;  %s640_s16 = smov (!%p188_p6, %s527_s16), 1 }
  0x2b   : > { %v213_v19 = vadd.f32 %v212_v8, %v211_v12  ;;  %s378_s8 = smul.u32 24, %s640_s16 }
  0x2c   : > { %v206_v21 = vadd.f32 %v205_v16, %v204_v18 }
  0x2d   : > { %v215_v22 = vadd.f32 %v214_v17, %v213_v19  ;;  %s192_s11 = scalar_lea.vmem %s631_s3, %s378_s8 }
  0x2e   : > { %v208_v23 = vadd.f32 %v207_v20, %v206_v21 }
  0x2f   : > { %367 = vmatmul.msk.f32.vlgmr.msra.gmra.mxu3 %vm201_vm0, %v215_v22 }
  0x30   : > { %366 = vmatmul.msk.f32.vlgmr.msra.gmra.mxu0 %vm201_vm0, %v208_v23 }
  0xad   : > { %v241_v25 = vpop.f32.mrf.mxu0 }
  0xb2   : > { %v244_v24 = vpop.f32.mrf.mxu3 }
  0xb3   : > { %273 = vmatpush.msra.mxu1 %v244_v24  ;;  %376 = vmatpush.msra.mxu2 %v244_v24 }
  0xb5   : > { %274 = vmatpush.msra.mxu1 %v241_v25  ;;  %377 = vmatpush.msra.mxu2 %v241_v25 }
  0xb6   : > { %369 = vmatmul.msk.f32.vlgmr.msra.gmra.mxu2 %vm201_vm0, %v248_v26  ;;  %368 = vmatmul.msk.f32.vlgmr.msra.gmra.mxu1 %vm201_vm0, %v247_v27 }
  0xbe   : > { %370 = vmatmul.msk.f32.gmra.mxu2 %vm201_vm0, %v249_v28 }
 0x133   : > { %v276_v29 = vpop.f32.mrf.mxu1 }
 0x134   : > { %286 = vst.msk [vmem:[%s192_s11] sm:$0xff] %vm285_vm1, %v276_v29 }
 0x139   : > { %v279_v30 = vpop.f32.mrf.mxu2 }
 0x13a   : > { %287 = vst.msk [vmem:[%s192_s11 + $0x8] sm:$0xff] %vm285_vm1, %v279_v30 }
 0x141   : > { %v282_v31 = vpop.f32.mrf.mxu2 }
 0x142   : > { %289 = vst.msk [vmem:[%s192_s11 + $0x10] sm:$0x3f] %vm288_vm2, %v282_v31 }
 0x143 PF: > { %p13_p7 = scmp.ge.s32.totalorder %s530_s17, 4   ;;  %s635_s12 = smov %s476_s13 }
 0x144   : > { %s636_s13 = smov %s480_s14  ;;  %s637_s14 = smov %s540_s20 }
 0x145   : > { %s638_s15 = smov %s530_s17  ;;  %15 = sbr.rel (!%p13_p7) target bundleno = 3 (0x3), region = 72 }
 0x14a   :  { %311 = vsyncpa [#allocation3], 1 }
 0x14b   :  { %313 = vsyncpa [#allocation3 + $0x1], 1 }

</bundles_post_ra>
